<compile_context>
chip_gen: v5e
topology: v5e:2x2
jax: 0.10.0
libtpu: 0.0.40
codegen_flags: <defaults>
</compile_context>

<pallas_src>
import jax
import jax.numpy as jnp
from jax.experimental import pallas as pl
from jax.experimental.pallas import tpu as pltpu


def _copy_kernel(src_ref, dst_ref):
    # src_ref / dst_ref: (tile_rows, lane) VMEM tiles — straight copy.
    dst_ref[...] = src_ref[...]


def _round_up(x: int, m: int) -> int:
    return (x + m - 1) // m * m


def positional_embedding_forward(pos_emb: jax.Array, x: jax.Array) -> jax.Array:
    """Return pos_emb[:, :x.shape[1], :] via a Pallas TPU kernel.

    pos_emb: (1, max_length, D)
    x:       (B, seq_len, ...) — only x.shape[1] (sequence length) is used.
    """
    _, max_length, D = pos_emb.shape
    seq_len = x.shape[1]
    assert 0 < seq_len <= max_length, "sequence longer than max_length"

    dtype = pos_emb.dtype
    itemsize = jnp.dtype(dtype).itemsize
    sublane = max(8, 32 // itemsize)  # 8 for f32, 16 for bf16, 32 for int8/fp8

    total_out = seq_len * D
    total_in = max_length * D

    if D % 128 == 0:
        # Rows are already lane-dense.
        lane, in_rows, out_rows = D, max_length, seq_len
        src2d = pos_emb.reshape(max_length, D)
    elif total_out % 128 == 0 and total_in % 128 == 0:
        # Fold the contiguous row-major slab into 128-wide rows (free reshape)
        # so output stores are unmasked, full-lane writes.
        lane, in_rows, out_rows = 128, total_in // 128, total_out // 128
        src2d = pos_emb.reshape(in_rows, 128)
    else:
        # Fallback: keep D on the lane axis (stores may be masked if D < 128).
        lane, in_rows, out_rows = D, max_length, seq_len
        src2d = pos_emb.reshape(max_length, D)

    # Tile rows: largest multiple of the sublane packing under ~4 MiB / tile.
    bytes_per_row = lane * itemsize
    tile_budget_bytes = 4 * 1024 * 1024
    tile_rows = max(sublane,
                    (tile_budget_bytes // bytes_per_row) // sublane * sublane)
    tile_rows = min(tile_rows, _round_up(out_rows, sublane))

    grid = (pl.cdiv(out_rows, tile_rows),)

    out2d = pl.pallas_call(
        _copy_kernel,
        out_shape=jax.ShapeDtypeStruct((out_rows, lane), dtype),
        grid_spec=pltpu.PrefetchScalarGridSpec(
            num_scalar_prefetch=0,
            grid=grid,
            in_specs=[pl.BlockSpec((tile_rows, lane), lambda i: (i, 0))],
            out_specs=pl.BlockSpec((tile_rows, lane), lambda i: (i, 0)),
        ),
        compiler_params=pltpu.CompilerParams(
            dimension_semantics=("parallel",),
            vmem_limit_bytes=32 * 1024 * 1024,
        ),
        cost_estimate=pl.CostEstimate(
            flops=0,
            transcendentals=0,
            bytes_accessed=2 * total_out * itemsize,  # read + write of the slice
        ),
    )(src2d)

    return out2d.reshape(1, seq_len, D)


if __name__ == "__main__":
    # Small shapes consistent with the module's forward pass.
    max_length = 64
    embedding_dim = 32
    batch = 2
    seq_len = 32

    key = jax.random.PRNGKey(0)
    k_param, k_x = jax.random.split(key)

    # nn.Parameter(torch.zeros(1, max_length, embedding_dim)) — same shape,
    # but filled with deterministic random values so the sliced copy is
    # actually verifiable (zeros would trivially pass).
    pos_emb = jax.random.normal(
        k_param, (1, max_length, embedding_dim), dtype=jnp.float32)

    # x only contributes its sequence length; give it a token-embedding shape.
    x = jax.random.normal(
        k_x, (batch, seq_len, embedding_dim), dtype=jnp.float32)

    out = positional_embedding_forward(pos_emb, x)
    out = jax.block_until_ready(out)

    # Reference: plain slice.
    ref = pos_emb[:, :seq_len, :]
    assert out.shape == (1, seq_len, embedding_dim), out.shape
    assert out.dtype == pos_emb.dtype
    assert jnp.array_equal(out, ref), "mismatch vs reference slice"

    print("KERNEL_OK")
</pallas_src>

<mosaic_0001>
module attributes {stable_mosaic.version = 11 : i64} {
  func.func @_copy_kernel(%arg0: i32, %arg1: memref<8x128xf32, #tpu.memory_space<vmem>>, %arg2: memref<8x128xf32, #tpu.memory_space<vmem>>) attributes {dimension_semantics = [#tpu.dimension_semantics<parallel>], iteration_bounds = array<i64: 1>, scalar_prefetch = 0 : i64, scratch_operands = 0 : i64, tpu.core_type = #tpu.core_type<tc>, window_params = [{transform_indices = @transform_0, window_bounds = array<i64: 8, 128>}, {transform_indices = @transform_1, window_bounds = array<i64: 8, 128>}]} {
    %c0 = arith.constant 0 : index
    %c0_0 = arith.constant 0 : index
    %0 = vector.load %arg1[%c0, %c0_0] : memref<8x128xf32, #tpu.memory_space<vmem>>, vector<8x128xf32>
    %c0_1 = arith.constant 0 : index
    %c0_2 = arith.constant 0 : index
    %1 = vector.load %arg2[%c0_1, %c0_2] : memref<8x128xf32, #tpu.memory_space<vmem>>, vector<8x128xf32>
    tpu.vector_store %arg2[%c0_1, %c0_2], %0 {strides = array<i32>} : memref<8x128xf32, #tpu.memory_space<vmem>>, vector<8x128xf32>,
    return
  }
  func.func @transform_0(%arg0: i32) -> (i32, i32) {
    %c0_i32 = arith.constant 0 : i32
    %c0_i32_0 = arith.constant 0 : i32
    return %arg0, %c0_i32 : i32, i32
  }
  func.func @transform_1(%arg0: i32) -> (i32, i32) {
    %c0_i32 = arith.constant 0 : i32
    %c0_i32_0 = arith.constant 0 : i32
    return %arg0, %c0_i32 : i32, i32
  }
}

</mosaic_0001>

<bundles_post_ra>
// kernel: tpu_custom_call.1
= control target key start
LH: loop header
LB: loop body
LE: loop exit
PB: predicated region body
PF: predicated region fallthrough
CT: control target
= control target key end

     0   :  { %6 = vsyncpa [#allocation3], 0  ;;  %s114_s0 = inlined_call_operand.hbm [shape: f32[16,128], index: 0, kind: input, shape index: {}]   ;;  %s115_s1 = inlined_call_operand.hbm [shape: f32[8,128], index: 1, kind: output, shape index: {}]  }
   0x1   :  { %7 = vsyncpa [#allocation4], 0  ;;  %s13_s8 = sshll.u32 %s114_s0, 4  ;;  %s96_s9 = smov [#allocation2]   ;;  %s14_s8 = int_to_ptr.hbm [resolvable:$true] %s13_s8 }
   0x2   :  { %s15_s10 = sshll.u32 %s96_s9, 4  ;;  %s16_s10 = int_to_ptr.vmem [resolvable:$true] %s15_s10 }
   0x3   :  { %18 = dma.hbm_to_vmem [thread:$0]  %s14_s8, 128, %s16_s10, [#allocation3]  }
   0x4   :  { %92 = dma.done.wait [#allocation3], 128  }
   0x5   :  { %93 = vsyncadd [#allocation3], 4294967168  ;;  %s97_s11 = smov [#allocation5]   ;;  %s32_s15 = sshll.u32 %s115_s1, 4  ;;  %v23_v0 = vld [vmem:[#allocation2] sm:$0xff]  ;;  %s33_s15 = int_to_ptr.hbm [resolvable:$true] %s32_s15 }
   0x6   :  { %s30_s12 = sshll.u32 %s97_s11, 4  ;;  %24 = vst [vmem:[#allocation5] sm:$0xff] %v23_v0  ;;  %s31_s12 = int_to_ptr.vmem [resolvable:$true] %s30_s12 }
   0x7   :  { %35 = dma.vmem_to_hbm [thread:$0]  %s31_s12, 128, %s33_s15, [#allocation4]  }
   0x8   :  { %94 = dma.done.wait [#allocation4], 128  }
   0x9   :  { %95 = vsyncadd [#allocation4], 4294967168 }
   0xa   :  { %40 = vsyncpa [#allocation3], 1 }
   0xb   :  { %41 = vsyncpa [#allocation4], 1 }

</bundles_post_ra>
